<compile_context>
chip_gen: v7x
topology: tpu7x:2x2x1
jax: 0.10.0
libtpu: 0.0.40
codegen_flags: <defaults>
</compile_context>

<pallas_src>
import jax
import jax.numpy as jnp
from jax.experimental import pallas as pl
from jax.experimental.pallas import tpu as pltpu

_LANE_W = 128        # lane-dense row width (full vreg lane extent)
_MAX_CHUNKS = 8      # max number of concurrent HBM->HBM DMAs


def identity(x):
    """True Identity: no kernel launch, no HBM traffic. Preferred in production."""
    return x


def _make_dma_copy_kernel(starts, sizes):
    """Build a kernel that copies a (rows, _LANE_W) HBM array via chunked DMAs."""
    n_chunks = len(starts)

    def kernel(x_hbm, o_hbm, sems):
        copies = []
        for c in range(n_chunks):                 # static unroll, <= _MAX_CHUNKS
            cp = pltpu.make_async_copy(
                x_hbm.at[pl.ds(starts[c], sizes[c])],
                o_hbm.at[pl.ds(starts[c], sizes[c])],
                sems.at[c],
            )
            cp.start()
            copies.append(cp)
        for cp in copies:                         # overlap: start all, then wait all
            cp.wait()

    return kernel


def _chunk_rows(rows, align):
    """Split [0, rows) into <= _MAX_CHUNKS contiguous pieces, starts aligned to `align`."""
    unit_count = rows // align
    k = max(1, min(_MAX_CHUNKS, unit_count))
    if k == 1:
        return (0,), (rows,)
    base, rem = divmod(unit_count, k)
    sizes = [(base + (1 if i < rem else 0)) * align for i in range(k)]
    sizes[-1] += rows - unit_count * align        # ragged tail rows go to the last chunk
    starts = [0]
    for s in sizes[:-1]:
        starts.append(starts[-1] + s)
    return tuple(starts), tuple(sizes)


@jax.jit
def _identity_copy(x):
    # All shape/dtype logic below is trace-time (static per jit signature).
    rows = x.size // _LANE_W
    itemsize = x.dtype.itemsize
    align = {1: 32, 2: 16}.get(itemsize, 8)       # sublane packing per dtype width
    starts, sizes = _chunk_rows(rows, align)

    x2 = x.reshape(rows, _LANE_W)                 # contiguous: bitcast under jit
    out2 = pl.pallas_call(
        _make_dma_copy_kernel(starts, sizes),
        out_shape=jax.ShapeDtypeStruct((rows, _LANE_W), x.dtype),
        in_specs=[pl.BlockSpec(memory_space=pl.ANY)],    # raw HBM ref, no auto-DMA
        out_specs=pl.BlockSpec(memory_space=pl.ANY),     # raw HBM ref, no auto-DMA
        scratch_shapes=[pltpu.SemaphoreType.DMA((len(starts),))],
    )(x2)
    return out2.reshape(x.shape)


def identity_pallas(x):
    """Identity.forward(x) -> x, materialized via chunked HBM->HBM DMA copy."""
    n = x.size
    if n == 0 or n % _LANE_W != 0:
        # Awkward sizes: take the exact zero-cost identity path instead of the
        # old pad + copy + slice fallback (which added ~2 extra full HBM passes).
        return x
    return _identity_copy(x)


if __name__ == "__main__":
    key = jax.random.PRNGKey(0)
    # Small NCHW-style input: (batch=2, channels=4, H=16, W=16) -> 2048 elements.
    x = jax.random.normal(key, (2, 4, 16, 16), dtype=jnp.float32)

    y = jax.block_until_ready(identity_pallas(x))
    assert y.shape == x.shape
    assert y.dtype == x.dtype
    assert bool(jnp.array_equal(y, x))

    # Non-multiple-of-128 element counts take the true-identity (no-copy) path.
    x_odd = jax.random.normal(jax.random.PRNGKey(1), (3, 5, 7), dtype=jnp.float32)
    assert identity_pallas(x_odd) is x_odd

    # Zero-cost production path (the real Identity).
    assert identity(x) is x

    print("KERNEL_OK")
</pallas_src>

<mosaic_0001>
module attributes {stable_mosaic.version = 11 : i64} {
  func.func @kernel(%arg0: memref<16x128xf32, #tpu.memory_space<any>>, %arg1: memref<16x128xf32, #tpu.memory_space<any>>, %arg2: memref<2x!tpu.dma_semaphore, #tpu.memory_space<semaphore_mem>>) attributes {dimension_semantics = [], scalar_prefetch = 0 : i64, scratch_operands = 1 : i64, tpu.core_type = #tpu.core_type<tc>} {
    %c0_i32 = arith.constant 0 : i32
    %c0_i32_0 = arith.constant 0 : i32
    %c0_i32_1 = arith.constant 0 : i32
    %0 = tpu.memref_slice %arg0[%c0_i32_0, %c0_i32_1] : memref<16x128xf32, #tpu.memory_space<any>> -> memref<8x128xf32, #tpu.memory_space<any>>
    %c0_i32_2 = arith.constant 0 : i32
    %c0_i32_3 = arith.constant 0 : i32
    %1 = tpu.memref_slice %arg1[%c0_i32_2, %c0_i32_3] : memref<16x128xf32, #tpu.memory_space<any>> -> memref<8x128xf32, #tpu.memory_space<any>>
    %2 = tpu.memref_slice %arg2[%c0_i32] : memref<2x!tpu.dma_semaphore, #tpu.memory_space<semaphore_mem>> -> memref<1x!tpu.dma_semaphore, #tpu.memory_space<semaphore_mem>>
    %3 = tpu.memref_squeeze %2 : memref<1x!tpu.dma_semaphore, #tpu.memory_space<semaphore_mem>> -> memref<!tpu.dma_semaphore, #tpu.memory_space<semaphore_mem>>
    tpu.enqueue_dma source(%0 : memref<8x128xf32, #tpu.memory_space<any>>) target(%1 : memref<8x128xf32, #tpu.memory_space<any>>) target_semaphore(%3 : memref<!tpu.dma_semaphore, #tpu.memory_space<semaphore_mem>>)
    %c1_i32 = arith.constant 1 : i32
    %c8_i32 = arith.constant 8 : i32
    %c0_i32_4 = arith.constant 0 : i32
    %4 = tpu.memref_slice %arg0[%c8_i32, %c0_i32_4] : memref<16x128xf32, #tpu.memory_space<any>> -> memref<8x128xf32, #tpu.memory_space<any>>
    %c8_i32_5 = arith.constant 8 : i32
    %c0_i32_6 = arith.constant 0 : i32
    %5 = tpu.memref_slice %arg1[%c8_i32_5, %c0_i32_6] : memref<16x128xf32, #tpu.memory_space<any>> -> memref<8x128xf32, #tpu.memory_space<any>>
    %6 = tpu.memref_slice %arg2[%c1_i32] : memref<2x!tpu.dma_semaphore, #tpu.memory_space<semaphore_mem>> -> memref<1x!tpu.dma_semaphore, #tpu.memory_space<semaphore_mem>>
    %7 = tpu.memref_squeeze %6 : memref<1x!tpu.dma_semaphore, #tpu.memory_space<semaphore_mem>> -> memref<!tpu.dma_semaphore, #tpu.memory_space<semaphore_mem>>
    tpu.enqueue_dma source(%4 : memref<8x128xf32, #tpu.memory_space<any>>) target(%5 : memref<8x128xf32, #tpu.memory_space<any>>) target_semaphore(%7 : memref<!tpu.dma_semaphore, #tpu.memory_space<semaphore_mem>>)
    %c0_i32_7 = arith.constant 0 : i32
    %c0_i32_8 = arith.constant 0 : i32
    %c0_i32_9 = arith.constant 0 : i32
    %8 = tpu.memref_slice %arg0[%c0_i32_8, %c0_i32_9] : memref<16x128xf32, #tpu.memory_space<any>> -> memref<8x128xf32, #tpu.memory_space<any>>
    %c0_i32_10 = arith.constant 0 : i32
    %c0_i32_11 = arith.constant 0 : i32
    %9 = tpu.memref_slice %arg1[%c0_i32_10, %c0_i32_11] : memref<16x128xf32, #tpu.memory_space<any>> -> memref<8x128xf32, #tpu.memory_space<any>>
    %10 = tpu.memref_slice %arg2[%c0_i32_7] : memref<2x!tpu.dma_semaphore, #tpu.memory_space<semaphore_mem>> -> memref<1x!tpu.dma_semaphore, #tpu.memory_space<semaphore_mem>>
    %11 = tpu.memref_squeeze %10 : memref<1x!tpu.dma_semaphore, #tpu.memory_space<semaphore_mem>> -> memref<!tpu.dma_semaphore, #tpu.memory_space<semaphore_mem>>
    tpu.wait_dma2 semaphore(%11 : memref<!tpu.dma_semaphore, #tpu.memory_space<semaphore_mem>>) src(%8 : memref<8x128xf32, #tpu.memory_space<any>>) dst(%9 : memref<8x128xf32, #tpu.memory_space<any>>)
    %c1_i32_12 = arith.constant 1 : i32
    %c8_i32_13 = arith.constant 8 : i32
    %c0_i32_14 = arith.constant 0 : i32
    %12 = tpu.memref_slice %arg0[%c8_i32_13, %c0_i32_14] : memref<16x128xf32, #tpu.memory_space<any>> -> memref<8x128xf32, #tpu.memory_space<any>>
    %c8_i32_15 = arith.constant 8 : i32
    %c0_i32_16 = arith.constant 0 : i32
    %13 = tpu.memref_slice %arg1[%c8_i32_15, %c0_i32_16] : memref<16x128xf32, #tpu.memory_space<any>> -> memref<8x128xf32, #tpu.memory_space<any>>
    %14 = tpu.memref_slice %arg2[%c1_i32_12] : memref<2x!tpu.dma_semaphore, #tpu.memory_space<semaphore_mem>> -> memref<1x!tpu.dma_semaphore, #tpu.memory_space<semaphore_mem>>
    %15 = tpu.memref_squeeze %14 : memref<1x!tpu.dma_semaphore, #tpu.memory_space<semaphore_mem>> -> memref<!tpu.dma_semaphore, #tpu.memory_space<semaphore_mem>>
    tpu.wait_dma2 semaphore(%15 : memref<!tpu.dma_semaphore, #tpu.memory_space<semaphore_mem>>) src(%12 : memref<8x128xf32, #tpu.memory_space<any>>) dst(%13 : memref<8x128xf32, #tpu.memory_space<any>>)
    return
  }
}

</mosaic_0001>

<bundles_post_ra>
// kernel: _identity_copy.1
= control target key start
LH: loop header
LB: loop body
LE: loop exit
PB: predicated region body
PF: predicated region fallthrough
CT: control target
= control target key end

     0   :  { %s159_s0 = inlined_call_operand.vmem [shape: f32[16,128], index: 0, kind: input, shape index: {}]   ;;  %s160_s1 = inlined_call_operand.vmem [shape: f32[16,128], index: 1, kind: output, shape index: {}]  }
   0x1   :  { %v38_v0 = vld [vmem:[%s159_s0] sm:$0xff] }
   0x2   :  { %39 = vst [vmem:[%s160_s1] sm:$0xff] %v38_v0 }
   0x3   :  { %47 = vsyncadd [#allocation2], 128  ;;  %v127_v1 = vld [vmem:[%s159_s0 + $0x8] sm:$0xff] }
   0x4   :  { %128 = vst [vmem:[%s160_s1 + $0x8] sm:$0xff] %v127_v1 }
   0x5   :  { %92 = vsyncadd [#allocation2 + $0x1], 128 }
   0x6   :  { %133 = dma.done.wait [#allocation2], 128 }
   0x7   :  { %134 = vsyncadd [#allocation2], 4294967168 }
   0x8   :  { %135 = dma.done.wait [#allocation2 + $0x1], 128 }
   0x9   :  { %136 = vsyncadd [#allocation2 + $0x1], 4294967168 }
   0xa   :  { %98 = vsyncmov [#allocation2] }
   0xd   :  { %s99_s14 = vpop.sfrf %98 }
   0xe   :  { %p131_p0 = scmp.ne.s32.totalorder %s99_s14, 0 }
  0x10   :  { %103 = shalt.err (%p131_p0)  }
  0x11   :  { %105 = vsyncmov [#allocation2 + $0x1] }
  0x14   :  { %s106_s15 = vpop.sfrf %105 }
  0x15   :  { %p132_p1 = scmp.ne.s32.totalorder %s106_s15, 0 }
  0x17   :  { %110 = shalt.err (%p132_p1)  }

</bundles_post_ra>
